<compile_context>
chip_gen: v7x
topology: tpu7x:2x2x1
jax: 0.10.0
libtpu: 0.0.40
codegen_flags: <defaults>
</compile_context>

<pallas_src>
import jax
import jax.numpy as jnp
from jax.experimental import pallas as pl
from jax.experimental.pallas import tpu as pltpu

_EPS = 1e-5
_VMEM_LIMIT_BYTES = 32 * 1024 * 1024  # above v5e's 16 MiB default, headroom on v7x's 64 MiB


def _embed_kernel(k_ref, km_ref, kr_ref, wk_ref, bk_ref, ws_ref, bs_ref,
                  ket_ref, v_ref):
    """Per key tile: ke^T = (Wk @ IN(k) + bk)^T and vcat = [se ; se*se]."""
    c = k_ref.shape[0]
    k = k_ref[...]                                        # (C, TK)
    kn = (k - km_ref[...]) * kr_ref[...]                  # instance_norm(k) tile
    ke = jnp.dot(wk_ref[...], kn, preferred_element_type=jnp.float32) + bk_ref[...]
    # one small transpose per key tile, amortized over every query tile
    ket_ref[...] = ke.T.astype(ket_ref.dtype)             # (TK, C)
    se = jnp.dot(ws_ref[...], k, preferred_element_type=jnp.float32) + bs_ref[...]
    v_ref[0:c, :] = se.astype(v_ref.dtype)
    v_ref[c:, :] = (se * se).astype(v_ref.dtype)


def _attn_kernel(q_ref, qm_ref, qr_ref, ket_ref, v_ref, wq_ref, bq_ref,
                 o_ref, qe_s, acc_s, m_s, l_s):
    """Flash-style online softmax over key tiles + AdaIN recombination."""
    c = q_ref.shape[0]
    ki = pl.program_id(2)

    @pl.when(ki == 0)
    def _init():
        qn = (q_ref[...] - qm_ref[...]) * qr_ref[...]                 # (C, TQ)
        qe_s[...] = (jnp.dot(wq_ref[...], qn,
                             preferred_element_type=jnp.float32) + bq_ref[...])
        acc_s[...] = jnp.zeros_like(acc_s)
        m_s[...] = jnp.full_like(m_s, -jnp.inf)
        l_s[...] = jnp.zeros_like(l_s)

    # scores s[t, q] = sum_c ke[c, t] * qe[c, q] -> (TK, TQ); plain NN matmul,
    # softmax reductions run along the sublane axis -> no transposes anywhere.
    s = jnp.dot(ket_ref[...], qe_s[...], preferred_element_type=jnp.float32)
    m_prev = m_s[...]
    m_new = jnp.maximum(m_prev, jnp.max(s, axis=0, keepdims=True))    # (1, TQ)
    alpha = jnp.exp(m_prev - m_new)
    p = jnp.exp(s - m_new)                                            # (TK, TQ)
    l_s[...] = alpha * l_s[...] + jnp.sum(p, axis=0, keepdims=True)
    # fused value matmul: [se ; se^2] (2C, TK) @ p (TK, TQ) -> (2C, TQ)
    acc_s[...] = alpha * acc_s[...] + jnp.dot(v_ref[...], p,
                                              preferred_element_type=jnp.float32)
    m_s[...] = m_new

    @pl.when(ki == pl.num_programs(2) - 1)
    def _finalize():
        inv_l = pl.reciprocal(l_s[...], approx=False)                 # (1, TQ)
        acc = acc_s[...] * inv_l
        mean = acc[0:c, :]
        ex2 = acc[c:, :]
        std = jnp.sqrt(jnp.maximum(ex2 - mean * mean, 0.0))           # relu(E[x^2]-m^2)
        qn = (q_ref[...] - qm_ref[...]) * qr_ref[...]                 # instance_norm(c)
        o_ref[...] = (qn * std + mean).astype(o_ref.dtype)


def _instance_norm_stats(x):
    """Per-(batch, channel) mean and rsqrt(var + eps), biased var, clamped >= 0."""
    m = jnp.mean(x, axis=-1, keepdims=True)
    v = jnp.mean(x * x, axis=-1, keepdims=True) - m * m
    r = jax.lax.rsqrt(jnp.maximum(v, 0.0) + _EPS)
    return m, r


def _pick_tile(n):
    for cand in (512, 256, 128):
        if n % cand == 0:
            return cand
    return n


def ada_attn(q, k, params, *, tq=None, tk=None):
    """AdaAttN forward. q, k: (B, C, H, W) float32 NCHW. Returns (B, C, H, W)."""
    B, C, H, W = q.shape
    N = H * W
    qf = q.reshape(B, C, N)
    kf = k.reshape(B, C, N)
    wq, bq, wk, bk, ws, bs_ = params
    bq2, bk2, bs2 = bq.reshape(C, 1), bk.reshape(C, 1), bs_.reshape(C, 1)

    tq = _pick_tile(N) if tq is None else tq
    tk = _pick_tile(N) if tk is None else tk
    assert N % tq == 0 and N % tk == 0, "spatial size must divide the tile size"
    # TODO(synk): pad ragged N (not a multiple of 128) instead of asserting.
    nq, nk = N // tq, N // tk

    # Instance-norm stats need the full spatial extent -> reduced once here,
    # applied per tile inside the kernels.
    qm, qr = _instance_norm_stats(qf)
    km, kr = _instance_norm_stats(kf)

    # Pass 1: key/style embeddings, computed once (not once per query tile).
    ket, vcat = pl.pallas_call(
        _embed_kernel,
        out_shape=(jax.ShapeDtypeStruct((B, N, C), jnp.float32),
                   jax.ShapeDtypeStruct((B, 2 * C, N), jnp.float32)),
        grid_spec=pltpu.PrefetchScalarGridSpec(
            num_scalar_prefetch=0,
            grid=(B, nk),
            in_specs=[
                pl.BlockSpec((pl.Squeezed(), C, tk), lambda b, j: (b, 0, j)),
                pl.BlockSpec((pl.Squeezed(), C, 1), lambda b, j: (b, 0, 0)),
                pl.BlockSpec((pl.Squeezed(), C, 1), lambda b, j: (b, 0, 0)),
                pl.BlockSpec((C, C), lambda b, j: (0, 0)),
                pl.BlockSpec((C, 1), lambda b, j: (0, 0)),
                pl.BlockSpec((C, C), lambda b, j: (0, 0)),
                pl.BlockSpec((C, 1), lambda b, j: (0, 0)),
            ],
            out_specs=(
                pl.BlockSpec((pl.Squeezed(), tk, C), lambda b, j: (b, j, 0)),
                pl.BlockSpec((pl.Squeezed(), 2 * C, tk), lambda b, j: (b, 0, j)),
            ),
        ),
        compiler_params=pltpu.CompilerParams(
            dimension_semantics=("parallel", "parallel"),
            vmem_limit_bytes=_VMEM_LIMIT_BYTES),
    )(kf, km, kr, wk, bk2, ws, bs2)

    # Pass 2: flash-style attention + attention-weighted AdaIN.
    out = pl.pallas_call(
        _attn_kernel,
        out_shape=jax.ShapeDtypeStruct((B, C, N), jnp.float32),
        grid_spec=pltpu.PrefetchScalarGridSpec(
            num_scalar_prefetch=0,
            grid=(B, nq, nk),
            in_specs=[
                # q block is constant along the key axis -> stays resident in VMEM
                pl.BlockSpec((pl.Squeezed(), C, tq), lambda b, i, j: (b, 0, i)),
                pl.BlockSpec((pl.Squeezed(), C, 1), lambda b, i, j: (b, 0, 0)),
                pl.BlockSpec((pl.Squeezed(), C, 1), lambda b, i, j: (b, 0, 0)),
                pl.BlockSpec((pl.Squeezed(), tk, C), lambda b, i, j: (b, j, 0)),
                pl.BlockSpec((pl.Squeezed(), 2 * C, tk), lambda b, i, j: (b, 0, j)),
                pl.BlockSpec((C, C), lambda b, i, j: (0, 0)),
                pl.BlockSpec((C, 1), lambda b, i, j: (0, 0)),
            ],
            out_specs=pl.BlockSpec((pl.Squeezed(), C, tq),
                                   lambda b, i, j: (b, 0, i)),
            scratch_shapes=[
                pltpu.VMEM((C, tq), jnp.float32),        # qe (query embedding)
                pltpu.VMEM((2 * C, tq), jnp.float32),    # [sum p*se ; sum p*se^2]
                pltpu.VMEM((1, tq), jnp.float32),        # running max
                pltpu.VMEM((1, tq), jnp.float32),        # running denom
            ],
        ),
        compiler_params=pltpu.CompilerParams(
            dimension_semantics=("parallel", "parallel", "arbitrary"),
            vmem_limit_bytes=_VMEM_LIMIT_BYTES),
    )(qf, qm, qr, ket, vcat, wq, bq2)

    return out.reshape(B, C, H, W)


def init_params(key, C):
    """Deterministic init mirroring nn.Conv1d(C, C, 1) default init shapes."""
    ks = jax.random.split(key, 6)
    bound = 1.0 / jnp.sqrt(C)  # fan_in = C * kernel_size(1)
    def u(k_, shape):
        return jax.random.uniform(k_, shape, jnp.float32, -bound, bound)
    return (u(ks[0], (C, C)), u(ks[1], (C,)),
            u(ks[2], (C, C)), u(ks[3], (C,)),
            u(ks[4], (C, C)), u(ks[5], (C,)))


def ada_attn_ref(q, k, params):
    """Pure-JAX reference (same math as the PyTorch forward)."""
    B, C, H, W = q.shape
    N = H * W
    wq, bq, wk, bk, ws, bs_ = params
    qf = q.reshape(B, C, N)
    kf = k.reshape(B, C, N)

    def inorm(x):
        m = jnp.mean(x, axis=-1, keepdims=True)
        v = jnp.mean(x * x, axis=-1, keepdims=True) - m * m
        return (x - m) / jnp.sqrt(v + _EPS)

    qn, kn = inorm(qf), inorm(kf)
    qe = jnp.einsum('oc,bcn->bon', wq, qn) + bq[None, :, None]
    ke = jnp.einsum('oc,bcn->bon', wk, kn) + bk[None, :, None]
    se = jnp.einsum('oc,bcn->bon', ws, kf) + bs_[None, :, None]
    attn = jax.nn.softmax(jnp.einsum('bcq,bck->bqk', qe, ke), axis=-1)
    sT = jnp.transpose(se, (0, 2, 1))
    mean = jnp.einsum('bqk,bkc->bqc', attn, sT)
    var = jnp.maximum(jnp.einsum('bqk,bkc->bqc', attn, sT * sT) - mean ** 2, 0.0)
    std = jnp.sqrt(var)
    cs = qn * jnp.transpose(std, (0, 2, 1)) + jnp.transpose(mean, (0, 2, 1))
    return cs.reshape(B, C, H, W)


if __name__ == "__main__":
    B, C, H, W = 2, 8, 16, 16   # qk_dim = v_dim = 8 (the forward uses c=q, s=k)
    key = jax.random.PRNGKey(0)
    kq, kk, kp = jax.random.split(key, 3)
    q = jax.random.normal(kq, (B, C, H, W), jnp.float32)
    k = jax.random.normal(kk, (B, C, H, W), jnp.float32)
    params = init_params(kp, C)

    # tq=tk=128 with N=256 -> attention grid (2, 2, 2): exercises the online-softmax
    # accumulation across key tiles and the resident q block along the inner axis.
    out = ada_attn(q, k, params, tq=128, tk=128)
    out = jax.block_until_ready(out)

    ref = ada_attn_ref(q, k, params)
    assert out.shape == (B, C, H, W)
    err = float(jnp.max(jnp.abs(out - ref)))
    assert jnp.allclose(out, ref, rtol=1e-3, atol=1e-3), f"max abs err {err}"
    print("KERNEL_OK")
</pallas_src>

<mosaic_0001>
module attributes {stable_mosaic.version = 11 : i64} {
  func.func @_embed_kernel(%arg0: i32, %arg1: i32, %arg2: memref<1x8x128xf32, #tpu.memory_space<vmem>>, %arg3: memref<1x8x1xf32, #tpu.memory_space<vmem>>, %arg4: memref<1x8x1xf32, #tpu.memory_space<vmem>>, %arg5: memref<8x8xf32, #tpu.memory_space<vmem>>, %arg6: memref<8x1xf32, #tpu.memory_space<vmem>>, %arg7: memref<8x8xf32, #tpu.memory_space<vmem>>, %arg8: memref<8x1xf32, #tpu.memory_space<vmem>>, %arg9: memref<1x128x8xf32, #tpu.memory_space<vmem>>, %arg10: memref<1x16x128xf32, #tpu.memory_space<vmem>>) attributes {dimension_semantics = [#tpu.dimension_semantics<parallel>, #tpu.dimension_semantics<parallel>], iteration_bounds = array<i64: 2, 2>, scalar_prefetch = 0 : i64, scratch_operands = 0 : i64, tpu.core_type = #tpu.core_type<tc>, window_params = [{transform_indices = @transform_0, window_bounds = array<i64: 1, 8, 128>}, {transform_indices = @transform_1, window_bounds = array<i64: 1, 8, 1>}, {transform_indices = @transform_2, window_bounds = array<i64: 1, 8, 1>}, {pipeline_mode = #tpu.pipeline_mode<synchronous>, transform_indices = @transform_3, window_bounds = array<i64: 8, 8>}, {pipeline_mode = #tpu.pipeline_mode<synchronous>, transform_indices = @transform_4, window_bounds = array<i64: 8, 1>}, {pipeline_mode = #tpu.pipeline_mode<synchronous>, transform_indices = @transform_5, window_bounds = array<i64: 8, 8>}, {pipeline_mode = #tpu.pipeline_mode<synchronous>, transform_indices = @transform_6, window_bounds = array<i64: 8, 1>}, {transform_indices = @transform_7, window_bounds = array<i64: 1, 128, 8>}, {transform_indices = @transform_8, window_bounds = array<i64: 1, 16, 128>}]} {
    %c0 = arith.constant 0 : index
    %c0_0 = arith.constant 0 : index
    %c0_1 = arith.constant 0 : index
    %0 = vector.load %arg2[%c0, %c0_0, %c0_1] : memref<1x8x128xf32, #tpu.memory_space<vmem>>, vector<1x8x128xf32>
    %1 = vector.shape_cast %0 : vector<1x8x128xf32> to vector<8x128xf32>
    %c0_2 = arith.constant 0 : index
    %c0_3 = arith.constant 0 : index
    %c0_4 = arith.constant 0 : index
    %2 = vector.load %arg3[%c0_2, %c0_3, %c0_4] : memref<1x8x1xf32, #tpu.memory_space<vmem>>, vector<1x8x1xf32>
    %3 = vector.shape_cast %2 : vector<1x8x1xf32> to vector<8x1xf32>
    %4 = vector.broadcast %3 : vector<8x1xf32> to vector<8x128xf32>
    %5 = arith.subf %1, %4 : vector<8x128xf32>
    %c0_5 = arith.constant 0 : index
    %c0_6 = arith.constant 0 : index
    %c0_7 = arith.constant 0 : index
    %6 = vector.load %arg4[%c0_5, %c0_6, %c0_7] : memref<1x8x1xf32, #tpu.memory_space<vmem>>, vector<1x8x1xf32>
    %7 = vector.shape_cast %6 : vector<1x8x1xf32> to vector<8x1xf32>
    %8 = vector.broadcast %7 : vector<8x1xf32> to vector<8x128xf32>
    %9 = arith.mulf %5, %8 : vector<8x128xf32>
    %c0_8 = arith.constant 0 : index
    %c0_9 = arith.constant 0 : index
    %10 = vector.load %arg5[%c0_8, %c0_9] : memref<8x8xf32, #tpu.memory_space<vmem>>, vector<8x8xf32>
    %cst = arith.constant dense<0.000000e+00> : vector<8x128xf32>
    %11 = tpu.matmul %10, %9, %cst {dimension_numbers = #tpu.dot_dimension_numbers<[1], [0], [0], [1], [0, 0, 1, 1], [], []>} : vector<8x8xf32>, vector<8x128xf32>, vector<8x128xf32> -> vector<8x128xf32>
    %c0_10 = arith.constant 0 : index
    %c0_11 = arith.constant 0 : index
    %12 = vector.load %arg6[%c0_10, %c0_11] : memref<8x1xf32, #tpu.memory_space<vmem>>, vector<8x1xf32>
    %13 = vector.broadcast %12 : vector<8x1xf32> to vector<8x128xf32>
    %14 = arith.addf %11, %13 : vector<8x128xf32>
    %15 = tpu.transpose %14, [1, 0] : vector<8x128xf32> -> vector<128x8xf32>
    %c0_12 = arith.constant 0 : index
    %c0_13 = arith.constant 0 : index
    %c0_14 = arith.constant 0 : index
    %16 = vector.load %arg9[%c0_12, %c0_13, %c0_14] : memref<1x128x8xf32, #tpu.memory_space<vmem>>, vector<1x128x8xf32>
    %17 = vector.shape_cast %16 : vector<1x128x8xf32> to vector<128x8xf32>
    %18 = vector.shape_cast %15 : vector<128x8xf32> to vector<1x128x8xf32>
    tpu.vector_store %arg9[%c0_12, %c0_13, %c0_14], %18 {strides = array<i32>} : memref<1x128x8xf32, #tpu.memory_space<vmem>>, vector<1x128x8xf32>,
    %c0_15 = arith.constant 0 : index
    %c0_16 = arith.constant 0 : index
    %19 = vector.load %arg7[%c0_15, %c0_16] : memref<8x8xf32, #tpu.memory_space<vmem>>, vector<8x8xf32>
    %cst_17 = arith.constant dense<0.000000e+00> : vector<8x128xf32>
    %20 = tpu.matmul %19, %1, %cst_17 {dimension_numbers = #tpu.dot_dimension_numbers<[1], [0], [0], [1], [0, 0, 1, 1], [], []>} : vector<8x8xf32>, vector<8x128xf32>, vector<8x128xf32> -> vector<8x128xf32>
    %c0_18 = arith.constant 0 : index
    %c0_19 = arith.constant 0 : index
    %21 = vector.load %arg8[%c0_18, %c0_19] : memref<8x1xf32, #tpu.memory_space<vmem>>, vector<8x1xf32>
    %22 = vector.broadcast %21 : vector<8x1xf32> to vector<8x128xf32>
    %23 = arith.addf %20, %22 : vector<8x128xf32>
    %c0_20 = arith.constant 0 : index
    %c0_21 = arith.constant 0 : index
    %c0_22 = arith.constant 0 : index
    %24 = vector.load %arg10[%c0_20, %c0_21, %c0_22] : memref<1x16x128xf32, #tpu.memory_space<vmem>>, vector<1x8x128xf32>
    %25 = vector.shape_cast %24 : vector<1x8x128xf32> to vector<8x128xf32>
    %26 = vector.shape_cast %23 : vector<8x128xf32> to vector<1x8x128xf32>
    tpu.vector_store %arg10[%c0_20, %c0_21, %c0_22], %26 {strides = array<i32>} : memref<1x16x128xf32, #tpu.memory_space<vmem>>, vector<1x8x128xf32>,
    %27 = arith.mulf %23, %23 : vector<8x128xf32>
    %c0_23 = arith.constant 0 : index
    %c8 = arith.constant 8 : index
    %c0_24 = arith.constant 0 : index
    %28 = vector.load %arg10[%c0_23, %c8, %c0_24] : memref<1x16x128xf32, #tpu.memory_space<vmem>>, vector<1x8x128xf32>
    %29 = vector.shape_cast %28 : vector<1x8x128xf32> to vector<8x128xf32>
    %30 = vector.shape_cast %27 : vector<8x128xf32> to vector<1x8x128xf32>
    tpu.vector_store %arg10[%c0_23, %c8, %c0_24], %30 {strides = array<i32>} : memref<1x16x128xf32, #tpu.memory_space<vmem>>, vector<1x8x128xf32>,
    return
  }
  func.func @transform_0(%arg0: i32, %arg1: i32) -> (i32, i32, i32) {
    %c0_i32 = arith.constant 0 : i32
    %c0_i32_0 = arith.constant 0 : i32
    return %arg0, %c0_i32, %arg1 : i32, i32, i32
  }
  func.func @transform_1(%arg0: i32, %arg1: i32) -> (i32, i32, i32) {
    %c0_i32 = arith.constant 0 : i32
    %c0_i32_0 = arith.constant 0 : i32
    %c0_i32_1 = arith.constant 0 : i32
    return %arg0, %c0_i32, %c0_i32_0 : i32, i32, i32
  }
  func.func @transform_2(%arg0: i32, %arg1: i32) -> (i32, i32, i32) {
    %c0_i32 = arith.constant 0 : i32
    %c0_i32_0 = arith.constant 0 : i32
    %c0_i32_1 = arith.constant 0 : i32
    return %arg0, %c0_i32, %c0_i32_0 : i32, i32, i32
  }
  func.func @transform_3(%arg0: i32, %arg1: i32) -> (i32, i32) {
    %c0_i32 = arith.constant 0 : i32
    %c0_i32_0 = arith.constant 0 : i32
    %c0_i32_1 = arith.constant 0 : i32
    return %c0_i32, %c0_i32_0 : i32, i32
  }
  func.func @transform_4(%arg0: i32, %arg1: i32) -> (i32, i32) {
    %c0_i32 = arith.constant 0 : i32
    %c0_i32_0 = arith.constant 0 : i32
    %c0_i32_1 = arith.constant 0 : i32
    return %c0_i32, %c0_i32_0 : i32, i32
  }
  func.func @transform_5(%arg0: i32, %arg1: i32) -> (i32, i32) {
    %c0_i32 = arith.constant 0 : i32
    %c0_i32_0 = arith.constant 0 : i32
    %c0_i32_1 = arith.constant 0 : i32
    return %c0_i32, %c0_i32_0 : i32, i32
  }
  func.func @transform_6(%arg0: i32, %arg1: i32) -> (i32, i32) {
    %c0_i32 = arith.constant 0 : i32
    %c0_i32_0 = arith.constant 0 : i32
    %c0_i32_1 = arith.constant 0 : i32
    return %c0_i32, %c0_i32_0 : i32, i32
  }
  func.func @transform_7(%arg0: i32, %arg1: i32) -> (i32, i32, i32) {
    %c0_i32 = arith.constant 0 : i32
    %c0_i32_0 = arith.constant 0 : i32
    return %arg0, %arg1, %c0_i32 : i32, i32, i32
  }
  func.func @transform_8(%arg0: i32, %arg1: i32) -> (i32, i32, i32) {
    %c0_i32 = arith.constant 0 : i32
    %c0_i32_0 = arith.constant 0 : i32
    return %arg0, %c0_i32, %arg1 : i32, i32, i32
  }
}

</mosaic_0001>

<bundles_post_ra>
// kernel: tpu_custom_call.1
= control target key start
LH: loop header
LB: loop body
LE: loop exit
PB: predicated region body
PF: predicated region fallthrough
CT: control target
= control target key end

     0   :  { %14 = vsyncpa [#allocation3], 0  ;;  %s1248_s0 = inlined_call_operand.vmem [shape: f32[2,8,256], index: 0, kind: input, shape index: {}]   ;;  %s1249_s1 = inlined_call_operand.vmem [shape: f32[2,8,1], index: 1, kind: input, shape index: {}]   ;;  %s1250_s2 = inlined_call_operand.vmem [shape: f32[2,8,1], index: 2, kind: input, shape index: {}]   ;;  %s1251_s3 = inlined_call_operand.vmem [shape: f32[8,8], index: 3, kind: input, shape index: {}]   ;;  %s1252_s4 = inlined_call_operand.vmem [shape: f32[8,1], index: 4, kind: input, shape index: {}]   ;;  %s1253_s5 = inlined_call_operand.vmem [shape: f32[8,8], index: 5, kind: input, shape index: {}]   ;;  %s1254_s6 = inlined_call_operand.vmem [shape: f32[8,1], index: 6, kind: input, shape index: {}]   ;;  %s1255_s7 = inlined_call_operand.vmem [shape: f32[2,256,8], index: 7, kind: output, shape index: {0}]   ;;  %s1256_s8 = inlined_call_operand.hbm [shape: f32[2,16,256], index: 8, kind: output, shape index: {1}]  }
   0x1   :  { %16 = vsyncpa [#allocation3 + $0x1], 0  ;;  %s1045_s27 = smov 0   ;;  %s1047_s28 = smov 0  }
   0x2   :  { %s1049_s29 = smov 0   ;;  %s1051_s30 = smov 0  }
   0x3   :  { %s1053_s9 = smov 0   ;;  %s1055_s10 = smov 0  }
   0x4   :  { %s1057_s11 = smov 0   ;;  %s1059_s12 = smov 0  }
   0x5 LB: > { %1262 = sst [smem:[#allocation5_spill]] %s971_s29  ;;  %s784_s13 = sadd.s32 4294967295, %s991_s12   ;;  %s991_s12 = sphi %s1059_s12, %s22_s12   ;;  %s987_s11 = sphi %s1057_s11, %s1275_s11   ;;  %s983_s10 = sphi %s1055_s10, %s1274_s10   ;;  %s979_s9 = sphi %s1053_s9, %s1273_s9   ;;  %s975_s30 = sphi %s1051_s30, %s1272_s30   ;;  %s971_s29 = sphi %s1049_s29, %s1271_s29   ;;  %s967_s28 = sphi %s1047_s28, %s1277_s28   ;;  %s963_s27 = sphi %s1045_s27, %s1276_s27  }
   0x6   : > { %1263 = sst [smem:[#allocation6_spill]] %s983_s10  ;;  %s785_s14 = sadd.s32 4294967294, %s991_s12  }
   0x7   : > { %1264 = sst [smem:[#allocation7_spill]] %s987_s11  ;;  %s31_s15 = sadd.s32 1, %s983_s10 }
   0x8   : > { %p32_p0 = scmp.ge.s32.totalorder %s31_s15, 2  ;;  %s34_s16 = sadd.s32 1, %s987_s11 }
   0x9   : > { %p245_p1 = scmp.ne.s32.totalorder %s971_s29, %s967_s28  ;;  %p246_p2 = scmp.eq.s32.totalorder %s784_s13, 3 }
   0xa   : > { %s1279_s15 = smov (%p32_p0, %s31_s15), 0  ;;  %s1281_s16 = smov (!%p32_p0, %s34_s16), %s987_s11 }
   0xb   : > { %1265 = sst [smem:[#allocation8_spill]] %s1279_s15  ;;  %s231_s17 = ssub.s32 %s983_s10, %s1279_s15 }
   0xc   : > { %p1096_p3 = por %p246_p2, %p245_p1  ;;  %p36_p4 = scmp.ge.s32.totalorder %s1281_s16, 2 }
   0xd   : > { %p251_p5 = scmp.ne.s32.totalorder %s967_s28, %s963_s27  ;;  %p252_p6 = scmp.eq.s32.totalorder %s785_s14, 3 }
   0xe   : > { %p788_p7 = scmp.ge.s32.totalorder %s991_s12, 1  ;;  %s1283_s16 = smov (%p36_p4, %s1281_s16), 0 }
   0xf   : > { %1267 = sst [smem:[#allocation9_spill]] %s1283_s16  ;;  %p1105_p8 = por %p252_p6, %p251_p5 }
  0x10   : > { %p307_p9 = scmp.lt.s32.totalorder %s991_s12, 5  ;;  %s230_s20 = ssub.s32 %s987_s11, %s1283_s16 }
  0x11   : > { %s235_s21 = sadd.s32 1, %s971_s29  ;;  %s232_s22 = sor.u32 %s231_s17, %s230_s20 }
  0x12   : > { %p308_p10 = pnand %p788_p7, %p307_p9  ;;  %p233_p11 = scmp.eq.s32.totalorder %s232_s22, 0 }
  0x13   : > { %p361_p12 = scmp.lt.s32.totalorder (!%p308_p10), %s979_s9, 1  ;;  %v993_v0 = vmov (!%p308_p10), 0   ;;  %p363_p13 = scmp.lt.s32.totalorder (!%p308_p10), %s975_s30, 1  ;;  %v994_v3 = vmov (!%p308_p10), 0.0   ;;  %vm995_vm0 = vmmov (!%p308_p10), 0   ;;  %vm409_vm1 = vcmask (!%p308_p10), 64512  }
  0x14   : > { %s1114_s23 = scalar_select %p233_p11, %s971_s29, %s235_s21  }
  0x15   : > { %311 = sbr.rel (%p308_p10) target bundleno = 572 (0x23c), region = 48  ;;  %895 = vset.pattern.permute.xlu0 (!%p308_p10), %v993_v0  ;;  %896 = vset.pattern.permute.xlu1 (!%p308_p10), %v993_v0  ;;  %v531_v5 = vld [vmem:[%s1253_s5] sm:$0xff] (!%p308_p10)  ;;  %s358_s13 = sand.u32 (!%p308_p10), 1, %s967_s28  }
  0x16   : > { %1269 = sst [smem:[#allocation10_spill]] %s1114_s23  ;;  %808 = vmatprep.subr.mxu0 (!%p308_p10), %v994_v3  ;;  %813 = vmatprep.subr.mxu1 (!%p308_p10), %v994_v3  ;;  %v403_v6 = vld [vmem:[%s1252_s4] sm:$0xff] (!%p308_p10)  ;;  %s1157_s10 = scalar_lea.sflag (!%p308_p10), [#allocation3], %s358_s13 }
  0x17   : > { %810 = vmatprep.mubr.msk.f32.mxu0 (!%p308_p10), %vm995_vm0, %v994_v3  ;;  %815 = vmatprep.mubr.msk.f32.mxu1 (!%p308_p10), %vm995_vm0, %v994_v3  ;;  %v532_v7 = vld [vmem:[%s1254_s6] sm:$0xff] (!%p308_p10) }
  0x18   : > { %406 = vperm.xlu1 (!%p308_p10), %896, %v403_v6   ;;  %v402_v12 = vld [vmem:[%s1251_s3] sm:$0xff] (!%p308_p10) }
  0x1c   : > { %s1118_s24 = scalar_select %p361_p12, %s979_s9, 1  ;;  %535 = vperm.xlu1 %896, %v532_v7  }
  0x1d   : > { %s364_s16 = scalar_select %p363_p13, %s975_s30, 1 }
  0x1e   : > { %s792_s25 = sshll.u32 %s1118_s24, 3  ;;  %s790_s22 = sshll.u32 %s1118_s24, 1 }
  0x1f   : > { %s372_s14 = scalar_lea.vmem %s1249_s1, %s792_s25  ;;  %s376_s21 = scalar_lea.vmem %s1250_s2, %s792_s25 }
  0x20   : > { %v388_v1 = vld [vmem:[%s372_s14] sm:$0xff]  ;;  %s366_s15 = sadd.s32 %s790_s22, %s364_s16  ;;  %s789_s14 = sshll.u32 %s358_s13, 4 }
  0x21   : > { %391 = vperm.xlu0 %895, %v388_v1   ;;  %v395_v2 = vld [vmem:[%s376_s21] sm:$0xff]  ;;  %s791_s11 = sshll.u32 %s366_s15, 3  ;;  %s360_s17 = scalar_lea.vmem [#allocation2], %s789_s14 }
  0x22   : > { %s368_s29 = scalar_lea.vmem %s1248_s0, %s791_s11  ;;  %s642_s20 = sshll.u32 %s360_s17, 4  ;;  %s1150_s20 = int_to_ptr.vmem [resolvable:$true] %s642_s20 }
  0x23   : > { %v387_v4 = vld [vmem:[%s368_s29] sm:$0xff]  ;;  %s800_s21 = sshll.u32 %s979_s9, 2  ;;  %s897_s11 = scalar_lea.vmem %s1150_s20, 256 }
  0x24   : > { %814 = vmatpush3.msra.mxu1 %v387_v4  ;;  %s639_s22 = sadd.s32 %s975_s30, %s800_s21  ;;  %p898_p0 = scmp.ne.s32.totalorder %s1150_s20, %s897_s11 }
  0x25   : > { %398 = vperm.xlu0 %895, %v395_v2   ;;  %816 = vmatmul.mubr.msk.f32.vlgmr.msra.gmra.mrb[0].mxu1 %vm409_vm1, %v531_v5  ;;  %s801_s25 = sshll.u32 %s639_s22, 7  ;;  %s996_s9 = smov [#allocation2]  }
  0x26   : > { %s1155_s15 = scalar_lea.hbm %s1256_s8, %s801_s25  ;;  %p899_p1 = pnand %p898_p0, %p1096_p3 }
  0x27   : > { %s901_s29 = sshll.u32 %s996_s9, 4  ;;  %s902_s29 = int_to_ptr.vmem [resolvable:$false] %s901_s29 }
  0x28   : > { %p900_p2 = pneg %p899_p1  ;;  %s903_s23 = scalar_lea.vmem %s902_s29, 512 }
  0x29   : > { %p904_p4 = scmp.lt.s32.totalorder %s1150_s20, %s902_s29  ;;  %p905_p5 = scmp.lt.s32.totalorder %s903_s23, %s897_s11 }
  0x2b   : > { %p906_p6 = por %p905_p5, %p904_p4 }
  0x2d   : > { %p907_p7 = pnand %p906_p6, %p900_p2 }
  0x97   : > { %v407_v13 = vpop.permute.xlu1 %406 }
  0x9b   : > { %v536_v14 = vpop.permute.xlu1 %535 }
  0xa0   : > { %v392_v8 = vpop.permute.xlu0 %391 }
  0xa1   : > { %v394_v9 = vsub.f32 %v387_v4, %v392_v8 }
  0xa4   : > { %v399_v10 = vpop.permute.xlu0 %398 }
  0xa5   : > { %v401_v11 = vmul.f32 %v399_v10, %v394_v9 }
  0xa7   : > { %809 = vmatpush3.msra.mxu0 %v401_v11 }
  0xa8   : > { %811 = vmatmul.mubr.msk.f32.vlgmr.msra.gmra.mrb[0].mxu0 %vm409_vm1, %v402_v12 }
  0xf8   : > { %v607_v15 = vpop.f32.mrb[0].mxu1 }
  0xf9   : > { %v608_v16 = vadd.f32 %v607_v15, %v536_v14  ;;  %v817_v17 = vpop.f32.mrb[1].mxu1 }
  0xfb   : > { %611 = vst [vmem:[%s360_s17] sm:$0xff] %v608_v16  ;;  %v612_v18 = vmul.f32 %v608_v16, %v608_v16 }
  0xfd   : > { %613 = vst [vmem:[%s360_s17 + $0x8] sm:$0xff] %v612_v18 }
 0x17b   : > { %v479_v19 = vpop.f32.mrb[0].mxu0 }
 0x17c   : > { %v480_v20 = vadd.f32 %v479_v19, %v407_v13  ;;  %v812_v21 = vpop.f32.mrb[1].mxu0 }
 0x17e   : > { %483 = vxpose.xlu0.b32.start.end [1/1] (short) %v480_v20, 128 }
 0x17f   : > { %910 = shalt.err (!%p907_p7)
}
 0x180   : > { %s911_s13 = scalar_lea.hbm %s1155_s15, 256  ;;  %s915_s21 = scalar_lea.hbm %s1256_s8, 1024 }
 0x181   : > { %p912_p9 = scmp.ne.s32.totalorder %s1155_s15, %s911_s13  ;;  %p916_p12 = scmp.lt.u32.totalorder %s1155_s15, %s1256_s8 }
 0x182   : > { %p917_p13 = scmp.lt.u32.totalorder %s915_s21, %s911_s13  ;;  %p919_p1 = scmp.lt.u32.totalorder %s911_s13, %s1155_s15 }
 0x183   : > { %p913_p10 = pnand %p912_p9, %p1096_p3 }
 0x184   : > { %p918_p0 = por %p917_p13, %p916_p12 }
 0x185   : > { %p914_p11 = pneg %p913_p10 }
 0x186   : > { %p920_p2 = por %p919_p1, %p918_p0 }
 0x188   : > { %p921_p4 = pnand %p920_p2, %p914_p11 }
 0x18a   : > { %924 = shalt.err (!%p921_p4)
}
 0x18b   : > { %s997_s26 = smov 128   ;;  %s998_s16 = smov 256  }
 0x18c   : > { %s999_s11 = smov 8   ;;  %s794_s9 = sshll.u32 %s975_s30, 4 }
 0x18d   : > { %818 = dma.vmem_to_hbm [thread:$0]  (%p1096_p3), %s1150_s20, 256, %s1155_s15, %s1157_s10, %s997_s26, %s998_s16, %s999_s11  }
 0x18e   : > { %p380_p5 = scmp.lt.s32.totalorder %s794_s9, 31  ;;  %s795_s29 = sshll.u32 %s1118_s24, 5 }
 0x190   : > { %s1285_s9 = smov (!%p380_p5, %s794_s9), 31 }
 0x191   : > { %s383_s23 = sadd.s32 %s795_s29, %s1285_s9 }
 0x192   : > { %s796_s13 = sshll.u32 %s383_s23, 3 }
 0x193   : > { %s1186_s21 = scalar_lea.vmem %s1255_s7, %s796_s13 }
 0x1fe   : > { %v499_v22 = vpop.trf.xlu0 }
 0x1ff   : > { %515 = vst.msk [vmem:[%s1186_s21] sm:$0xff] %vm409_vm1, %v499_v22 }
 0x202   : > { %v500_v23 = vpop.trf.xlu0 }
 0x203   : > { %516 = vst.msk [vmem:[%s1186_s21 + $0x8] sm:$0xff] %vm409_vm1, %v500_v23 }
 0x206   : > { %v501_v24 = vpop.trf.xlu0 }
 0x207   : > { %517 = vst.msk [vmem:[%s1186_s21 + $0x10] sm:$0xff] %vm409_vm1, %v501_v24 }
 0x20a   : > { %v502_v25 = vpop.trf.xlu0 }
 0x20b   : > { %518 = vst.msk [vmem:[%s1186_s21 + $0x18] sm:$0xff] %vm409_vm1, %v502_v25 }
 0x20e   : > { %v503_v26 = vpop.trf.xlu0 }
 0x20f   : > { %519 = vst.msk [vmem:[%s1186_s21 + $0x20] sm:$0xff] %vm409_vm1, %v503_v26 }
 0x212   : > { %v504_v27 = vpop.trf.xlu0 }
 0x213   : > { %520 = vst.msk [vmem:[%s1186_s21 + $0x28] sm:$0xff] %vm409_vm1, %v504_v27 }
 0x216   : > { %v505_v28 = vpop.trf.xlu0 }
 0x217   : > { %521 = vst.msk [vmem:[%s1186_s21 + $0x30] sm:$0xff] %vm409_vm1, %v505_v28 }
 0x21a   : > { %v506_v29 = vpop.trf.xlu0 }
 0x21b   : > { %522 = vst.msk [vmem:[%s1186_s21 + $0x38] sm:$0xff] %vm409_vm1, %v506_v29 }
 0x21e   : > { %v507_v30 = vpop.trf.xlu0 }
 0x21f   : > { %523 = vst.msk [vmem:[%s1186_s21 + $0x40] sm:$0xff] %vm409_vm1, %v507_v30 }
 0x222   : > { %v508_v31 = vpop.trf.xlu0 }
 0x223   : > { %524 = vst.msk [vmem:[%s1186_s21 + $0x48] sm:$0xff] %vm409_vm1, %v508_v31 }
 0x226   : > { %v509_v32 = vpop.trf.xlu0 }
 0x227   : > { %525 = vst.msk [vmem:[%s1186_s21 + $0x50] sm:$0xff] %vm409_vm1, %v509_v32 }
 0x22a   : > { %v510_v33 = vpop.trf.xlu0 }
 0x22b   : > { %526 = vst.msk [vmem:[%s1186_s21 + $0x58] sm:$0xff] %vm409_vm1, %v510_v33 }
 0x22e   : > { %v511_v34 = vpop.trf.xlu0 }
 0x22f   : > { %527 = vst.msk [vmem:[%s1186_s21 + $0x60] sm:$0xff] %vm409_vm1, %v511_v34 }
 0x232   : > { %v512_v35 = vpop.trf.xlu0 }
 0x233   : > { %528 = vst.msk [vmem:[%s1186_s21 + $0x68] sm:$0xff] %vm409_vm1, %v512_v35 }
 0x236   : > { %v513_v36 = vpop.trf.xlu0 }
 0x237   : > { %529 = vst.msk [vmem:[%s1186_s21 + $0x70] sm:$0xff] %vm409_vm1, %v513_v36 }
 0x23a   : > { %v514_v37 = vpop.trf.xlu0 }
 0x23b   : > { %530 = vst.msk [vmem:[%s1186_s21 + $0x78] sm:$0xff] %vm409_vm1, %v514_v37 }
 0x23c PF: > { %p824_p3 = scmp.ge.s32.totalorder %s991_s12, 2  ;;  %s669_s30 = sand.u32 1, %s963_s27  }
 0x23d   : > { %s670_s18 = scalar_lea.sflag [#allocation3], %s669_s30 }
 0x23e   : > { %p821_p6 = pnand %p824_p3, %p1105_p8 }
 0x240   : > { %958 = dma.done.wait (!%p821_p6), %s670_s18, 256  }
 0x241   : > { %960 = vsyncadd (!%p821_p6), %s670_s18, 4294967040  ;;  %s22_s12 = sadd.s32 1, %s991_s12   ;;  %s1270_s24 = sld [smem:[#allocation5_spill]] }
 0x242   : > { %p19_p7 = scmp.ge.s32.totalorder %s22_s12, 6   ;;  %s1271_s29 = sld [smem:[#allocation10_spill]] }
 0x243   : > { %s1272_s30 = sld [smem:[#allocation6_spill]]  ;;  %s1273_s9 = sld [smem:[#allocation7_spill]] }
 0x244   : > { %s1274_s10 = sld [smem:[#allocation8_spill]]  ;;  %s1275_s11 = sld [smem:[#allocation9_spill]] }
 0x245   : > { %s1276_s27 = smov %s967_s28  ;;  %21 = sbr.rel (!%p19_p7) target bundleno = 5 (0x5), region = 101 }
 0x247   : > { %s1277_s28 = smov %s1270_s24 }
 0x24c   :  { %675 = vsyncpa [#allocation3], 1 }
 0x24d   :  { %677 = vsyncpa [#allocation3 + $0x1], 1 }

</bundles_post_ra>
